<compile_context>
chip_gen: v7x
topology: tpu7x:2x2x1
jax: 0.10.0
libtpu: 0.0.40
codegen_flags: <defaults>
</compile_context>

<pallas_src>
import jax
import jax.numpy as jnp
from jax.experimental import pallas as pl
from jax.experimental.pallas import tpu as pltpu

LAMBDA1 = 200.0
LAMBDA2 = 0.001
LAMBDA3 = 1.0 / (224 * 224 * 3 * 32)  # loss3 coefficient (loss3 never returned)

_TARGET_TILE_ELEMS = 1 << 20  # ~1M elems/tile: 4 MiB f32 / 2 MiB bf16


def _cdiv(a, b):
    return -(-a // b)


def _round_up(a, b):
    return _cdiv(a, b) * b


def _plan_mask_layout(n):
    """Choose (cols, rows, pad, tile_rows, n_split, tiles_per_split) for a flat
    mask of n elements.  pad == 0 whenever n is divisible by 128 and there are
    at least 8 rows (true for the intended 32*3*224*224 mask)."""
    cols = 128
    for c in (512, 256, 128):
        if n % c == 0:
            cols = c
            break
    pad = (-n) % cols
    rows = (n + pad) // cols
    if rows < 8:                      # tiny mask: pad up to one (8, cols) tile
        pad += (8 - rows) * cols
        rows = 8

    target_rows = max(8, (_TARGET_TILE_ELEMS // cols) // 8 * 8)
    tile_rows = min(target_rows, (rows // 8) * 8)   # multiple of 8, <= rows
    n_tiles = _cdiv(rows, tile_rows)

    # Prefer an even tile count so the outer "parallel" axis can feed both
    # TensorCores on megacore parts (v7x); harmless serial loop on 1-TC chips.
    if n_tiles >= 2 and n_tiles % 2 == 1:
        even = n_tiles + 1
        tr = _round_up(_cdiv(rows, even), 8)
        if 8 <= tr <= (rows // 8) * 8 and (even - 1) * tr < rows:
            n_tiles, tile_rows = even, tr

    if n_tiles % 2 == 0:
        n_split, tiles_per_split = 2, n_tiles // 2
    else:
        n_split, tiles_per_split = 1, n_tiles
    return cols, rows, pad, tile_rows, n_split, tiles_per_split


def _make_loss_kernel(rows_valid, tiles_per_split, ragged):
    """rows_valid: real row count of the reshaped mask slab.
    ragged: True if tiles extend past rows_valid (needs in-kernel row mask)."""

    def kernel(x_ref, m_ref, mask_ref, out_ref, acc_ref):
        s = pl.program_id(0)
        t = pl.program_id(1)
        n_t = pl.num_programs(1)
        tile_rows, cols = mask_ref.shape

        # ---- per-split init of the vector accumulator ----
        @pl.when(t == 0)
        def _():
            acc_ref[...] = jnp.zeros_like(acc_ref)

        # ---- streaming sum(mask^2): VPU-only per-tile partial ----
        mk = mask_ref[...].astype(jnp.float32)
        if ragged:
            # Partial edge block: rows >= rows_valid hold garbage -> zero them.
            start_row = (s * tiles_per_split + t) * tile_rows
            row = jax.lax.broadcasted_iota(jnp.int32, (tile_rows, cols), 0)
            mk = jnp.where(start_row + row < rows_valid, mk, 0.0)
        sq = mk * mk
        # (tile_rows, cols) -> (tile_rows//8, 8, cols) is layout-preserving;
        # the axis-0 sum is plain vreg adds (no cross-lane traffic).
        acc_ref[...] += sq.reshape(tile_rows // 8, 8, cols).sum(axis=0)

        # ---- per-split epilogue: one cross-lane reduce + tiny KL term ----
        @pl.when(t == n_t - 1)
        def _():
            sq_total = jnp.sum(acc_ref[...])
            # PyTorch kl_div pointwise term: target*(log(target)-input),
            # 0 where target <= 0.  B*C elements; counted once (split 0 only).
            x = x_ref[...].astype(jnp.float32)
            m = m_ref[...].astype(jnp.float32)
            log_m = jnp.log(jnp.where(m > 0, m, 1.0))
            kl = jnp.sum(jnp.where(m > 0, m * (log_m - jnp.log(x)), 0.0))
            kl = jnp.where(s == 0, kl, 0.0)
            lane = jax.lax.broadcasted_iota(jnp.int32, out_ref.shape, 1)
            out_ref[...] = jnp.where(lane == 0, sq_total,
                                     jnp.where(lane == 1, kl, 0.0))

    return kernel


def loss_function_forward(x_logit, m_logit, mask):
    """Returns the scalar loss1 + loss2 (what the PyTorch module returns)."""
    n = mask.size
    cols, rows, pad, tile_rows, n_split, tiles_per_split = _plan_mask_layout(n)

    flat = jnp.reshape(mask, (-1,))
    if pad:
        # Only hit for masks smaller than one (8, cols) tile or element counts
        # not divisible by 128 -- negligible copy; zeros do not affect sum(m^2).
        flat = jnp.pad(flat, (0, pad))
    mask2d = flat.reshape(rows, cols)          # free (no copy) when pad == 0
    ragged = (n_split * tiles_per_split * tile_rows) != rows

    B, C = x_logit.shape
    kernel = _make_loss_kernel(rows, tiles_per_split, ragged)

    cost = pl.CostEstimate(
        flops=3 * rows * cols + 4 * B * C,
        transcendentals=2 * B * C,
        bytes_accessed=(mask2d.size * mask2d.dtype.itemsize
                        + x_logit.size * x_logit.dtype.itemsize
                        + m_logit.size * m_logit.dtype.itemsize
                        + n_split * 128 * 4),
    )

    out = pl.pallas_call(
        kernel,
        out_shape=jax.ShapeDtypeStruct((n_split, 128), jnp.float32),
        grid_spec=pltpu.PrefetchScalarGridSpec(
            num_scalar_prefetch=0,
            grid=(n_split, tiles_per_split),
            in_specs=[
                # logits: grid-resident blocks (fetched once, reduced once)
                pl.BlockSpec((B, C), lambda s, t: (0, 0)),
                pl.BlockSpec((B, C), lambda s, t: (0, 0)),
                # mask: streamed lane-dense ~3-4 MiB tiles, contiguous per split
                pl.BlockSpec((tile_rows, cols),
                             lambda s, t: (s * tiles_per_split + t, 0)),
            ],
            out_specs=pl.BlockSpec((1, 128), lambda s, t: (s, 0)),
            scratch_shapes=[pltpu.VMEM((8, cols), jnp.float32)],
        ),
        compiler_params=pltpu.CompilerParams(
            dimension_semantics=("parallel", "arbitrary")),
        cost_estimate=cost,
    )(x_logit, m_logit, mask2d)

    sq_sum = jnp.sum(out[:, 0])   # per-split partial sums of mask^2
    kl_sum = jnp.sum(out[:, 1])   # only split 0 contributes (others write 0)

    n_logit = x_logit.size        # kl_div 'mean' divides by total element count
    loss1 = -(kl_sum / n_logit) * LAMBDA1
    loss2 = jnp.sqrt(sq_sum) * LAMBDA2
    # loss3 is assigned but never returned by the PyTorch module; it is dropped
    # here to save a second full elementwise pass over the mask.
    # TODO(synk): if loss3 is ever needed, add a second running sum(mask) and
    # use the TRUE element count n (not the padded count) in
    # (sq_sum - sum_mask + 0.25*n) * LAMBDA3.
    return loss1 + loss2


def _reference(x_logit, m_logit, mask):
    x = x_logit.astype(jnp.float32)
    m = m_logit.astype(jnp.float32)
    pw = jnp.where(m > 0, m * (jnp.log(jnp.where(m > 0, m, 1.0)) - jnp.log(x)), 0.0)
    loss1 = -jnp.mean(pw) * LAMBDA1
    loss2 = jnp.sqrt(jnp.sum(mask.astype(jnp.float32) ** 2)) * LAMBDA2
    return loss1 + loss2


if __name__ == "__main__":
    key = jax.random.PRNGKey(0)
    k1, k2, k3, k4 = jax.random.split(key, 4)

    # --- small-shape check (single-tile path) ---
    B, C = 2, 32            # logits: batch=2, classes=32
    x_logit = jax.nn.softmax(jax.random.normal(k1, (B, C), jnp.float32), axis=-1)
    m_logit = jax.nn.softmax(jax.random.normal(k2, (B, C), jnp.float32), axis=-1)
    mask_small = jax.random.uniform(k3, (B, 3, 16, 16), jnp.float32)

    out_small = jax.block_until_ready(loss_function_forward(x_logit, m_logit, mask_small))
    ref_small = _reference(x_logit, m_logit, mask_small)
    assert jnp.allclose(out_small, ref_small, rtol=1e-5, atol=1e-5), (out_small, ref_small)

    # --- multi-tile check (exercises split=2, ragged last tile, no pad) ---
    mask_big = jax.random.uniform(k4, (8, 3, 224, 224), jnp.float32)
    out_big = jax.block_until_ready(loss_function_forward(x_logit, m_logit, mask_big))
    ref_big = _reference(x_logit, m_logit, mask_big)
    assert jnp.allclose(out_big, ref_big, rtol=2e-5, atol=1e-4), (out_big, ref_big)

    print("KERNEL_OK")
</pallas_src>

<mosaic_0001>
module attributes {stable_mosaic.version = 11 : i64} {
  func.func @kernel(%arg0: i32, %arg1: i32, %arg2: memref<2x32xf32, #tpu.memory_space<vmem>>, %arg3: memref<2x32xf32, #tpu.memory_space<vmem>>, %arg4: memref<8x512xf32, #tpu.memory_space<vmem>>, %arg5: memref<1x128xf32, #tpu.memory_space<vmem>>, %arg6: memref<8x512xf32, #tpu.memory_space<vmem>>) attributes {dimension_semantics = [#tpu.dimension_semantics<parallel>, #tpu.dimension_semantics<arbitrary>], iteration_bounds = array<i64: 1, 1>, scalar_prefetch = 0 : i64, scratch_operands = 1 : i64, tpu.core_type = #tpu.core_type<tc>, window_params = [{pipeline_mode = #tpu.pipeline_mode<synchronous>, transform_indices = @transform_0, window_bounds = array<i64: 2, 32>}, {pipeline_mode = #tpu.pipeline_mode<synchronous>, transform_indices = @transform_1, window_bounds = array<i64: 2, 32>}, {transform_indices = @transform_2, window_bounds = array<i64: 8, 512>}, {transform_indices = @transform_3, window_bounds = array<i64: 1, 128>}]} {
    %c0_i32 = arith.constant 0 : i32
    %0 = arith.cmpi eq, %arg1, %c0_i32 : i32
    %1 = arith.extui %0 : i1 to i32
    %c0_i32_0 = arith.constant 0 : i32
    %2 = arith.cmpi ne, %1, %c0_i32_0 : i32
    scf.if %2 {
      %cst_8 = arith.constant 0.000000e+00 : f32
      %13 = vector.broadcast %cst_8 : f32 to vector<8x512xf32>
      %c0_9 = arith.constant 0 : index
      %c0_10 = arith.constant 0 : index
      %14 = vector.load %arg6[%c0_9, %c0_10] : memref<8x512xf32, #tpu.memory_space<vmem>>, vector<8x512xf32>
      tpu.vector_store %arg6[%c0_9, %c0_10], %13 {strides = array<i32>} : memref<8x512xf32, #tpu.memory_space<vmem>>, vector<8x512xf32>,
    } else {
    }
    %c0 = arith.constant 0 : index
    %c0_1 = arith.constant 0 : index
    %3 = vector.load %arg4[%c0, %c0_1] : memref<8x512xf32, #tpu.memory_space<vmem>>, vector<8x512xf32>
    %4 = arith.mulf %3, %3 : vector<8x512xf32>
    %c0_2 = arith.constant 0 : index
    %c0_3 = arith.constant 0 : index
    %5 = vector.load %arg6[%c0_2, %c0_3] : memref<8x512xf32, #tpu.memory_space<vmem>>, vector<8x512xf32>
    %6 = vector.shape_cast %4 : vector<8x512xf32> to vector<1x8x512xf32>
    %cst = arith.constant dense<0.000000e+00> : vector<8x512xf32>
    %7 = vector.multi_reduction <add>, %6, %cst [0] : vector<1x8x512xf32> to vector<8x512xf32>
    %8 = arith.addf %5, %7 : vector<8x512xf32>
    %c0_4 = arith.constant 0 : index
    %c0_5 = arith.constant 0 : index
    %9 = vector.load %arg6[%c0_4, %c0_5] : memref<8x512xf32, #tpu.memory_space<vmem>>, vector<8x512xf32>
    tpu.vector_store %arg6[%c0_4, %c0_5], %8 {strides = array<i32>} : memref<8x512xf32, #tpu.memory_space<vmem>>, vector<8x512xf32>,
    %c0_i32_6 = arith.constant 0 : i32
    %10 = arith.cmpi eq, %arg1, %c0_i32_6 : i32
    %11 = arith.extui %10 : i1 to i32
    %c0_i32_7 = arith.constant 0 : i32
    %12 = arith.cmpi ne, %11, %c0_i32_7 : i32
    scf.if %12 {
      %c0_8 = arith.constant 0 : index
      %c0_9 = arith.constant 0 : index
      %13 = vector.load %arg6[%c0_8, %c0_9] : memref<8x512xf32, #tpu.memory_space<vmem>>, vector<8x512xf32>
      %14 = vector.shape_cast %13 : vector<8x512xf32> to vector<1x8x512xf32>
      %cst_10 = arith.constant dense<0.000000e+00> : vector<1xf32>
      %15 = vector.multi_reduction <add>, %14, %cst_10 [1, 2] : vector<1x8x512xf32> to vector<1xf32>
      %16 = vector.shape_cast %15 : vector<1xf32> to vector<1x1x1xf32>
      %17 = vector.extract %16[0, 0, 0] : f32 from vector<1x1x1xf32>
      %c0_11 = arith.constant 0 : index
      %c0_12 = arith.constant 0 : index
      %18 = vector.load %arg2[%c0_11, %c0_12] : memref<2x32xf32, #tpu.memory_space<vmem>>, vector<2x32xf32>
      %c0_13 = arith.constant 0 : index
      %c0_14 = arith.constant 0 : index
      %19 = vector.load %arg3[%c0_13, %c0_14] : memref<2x32xf32, #tpu.memory_space<vmem>>, vector<2x32xf32>
      %cst_15 = arith.constant 0.000000e+00 : f32
      %20 = vector.broadcast %cst_15 : f32 to vector<2x32xf32>
      %21 = arith.cmpf ogt, %19, %20 : vector<2x32xf32>
      %cst_16 = arith.constant 1.000000e+00 : f32
      %22 = vector.broadcast %cst_16 : f32 to vector<2x32xf32>
      %23 = arith.select %21, %19, %22 : vector<2x32xi1>, vector<2x32xf32>
      %24 = math.log %23 : vector<2x32xf32>
      %cst_17 = arith.constant 0.000000e+00 : f32
      %25 = vector.broadcast %cst_17 : f32 to vector<2x32xf32>
      %26 = arith.cmpf ogt, %19, %25 : vector<2x32xf32>
      %27 = math.log %18 : vector<2x32xf32>
      %28 = arith.subf %24, %27 : vector<2x32xf32>
      %29 = arith.mulf %19, %28 : vector<2x32xf32>
      %cst_18 = arith.constant 0.000000e+00 : f32
      %30 = vector.broadcast %cst_18 : f32 to vector<2x32xf32>
      %31 = arith.select %26, %29, %30 : vector<2x32xi1>, vector<2x32xf32>
      %32 = vector.shape_cast %31 : vector<2x32xf32> to vector<1x2x32xf32>
      %cst_19 = arith.constant dense<0.000000e+00> : vector<1xf32>
      %33 = vector.multi_reduction <add>, %32, %cst_19 [1, 2] : vector<1x2x32xf32> to vector<1xf32>
      %34 = vector.shape_cast %33 : vector<1xf32> to vector<1x1x1xf32>
      %35 = vector.extract %34[0, 0, 0] : f32 from vector<1x1x1xf32>
      %c0_i32_20 = arith.constant 0 : i32
      %36 = arith.cmpi eq, %arg0, %c0_i32_20 : i32
      %cst_21 = arith.constant 0.000000e+00 : f32
      %37 = arith.select %36, %35, %cst_21 : f32
      %38 = tpu.iota {dimensions = array<i32: 1>} : vector<1x128xi32>
      %c0_i32_22 = arith.constant 0 : i32
      %39 = vector.broadcast %c0_i32_22 : i32 to vector<1x128xi32>
      %40 = arith.cmpi eq, %38, %39 : vector<1x128xi32>
      %c1_i32 = arith.constant 1 : i32
      %41 = vector.broadcast %c1_i32 : i32 to vector<1x128xi32>
      %42 = arith.cmpi eq, %38, %41 : vector<1x128xi32>
      %cst_23 = arith.constant 0.000000e+00 : f32
      %43 = vector.broadcast %37 : f32 to vector<1x128xf32>
      %44 = vector.broadcast %cst_23 : f32 to vector<1x128xf32>
      %45 = arith.select %42, %43, %44 : vector<1x128xi1>, vector<1x128xf32>
      %46 = vector.broadcast %17 : f32 to vector<1x128xf32>
      %47 = arith.select %40, %46, %45 : vector<1x128xi1>, vector<1x128xf32>
      %c0_24 = arith.constant 0 : index
      %c0_25 = arith.constant 0 : index
      %48 = vector.load %arg5[%c0_24, %c0_25] : memref<1x128xf32, #tpu.memory_space<vmem>>, vector<1x128xf32>
      tpu.vector_store %arg5[%c0_24, %c0_25], %47 {strides = array<i32>} : memref<1x128xf32, #tpu.memory_space<vmem>>, vector<1x128xf32>,
    } else {
    }
    return
  }
  func.func @transform_0(%arg0: i32, %arg1: i32) -> (i32, i32) {
    %c0_i32 = arith.constant 0 : i32
    %c0_i32_0 = arith.constant 0 : i32
    %c0_i32_1 = arith.constant 0 : i32
    return %c0_i32, %c0_i32_0 : i32, i32
  }
  func.func @transform_1(%arg0: i32, %arg1: i32) -> (i32, i32) {
    %c0_i32 = arith.constant 0 : i32
    %c0_i32_0 = arith.constant 0 : i32
    %c0_i32_1 = arith.constant 0 : i32
    return %c0_i32, %c0_i32_0 : i32, i32
  }
  func.func @transform_2(%arg0: i32, %arg1: i32) -> (i32, i32) {
    %c1_i32 = arith.constant 1 : i32
    %0 = arith.muli %arg0, %c1_i32 : i32
    %1 = arith.addi %0, %arg1 : i32
    %c0_i32 = arith.constant 0 : i32
    %c0_i32_0 = arith.constant 0 : i32
    return %1, %c0_i32 : i32, i32
  }
  func.func @transform_3(%arg0: i32, %arg1: i32) -> (i32, i32) {
    %c0_i32 = arith.constant 0 : i32
    %c0_i32_0 = arith.constant 0 : i32
    return %arg0, %c0_i32 : i32, i32
  }
}

</mosaic_0001>

<bundles_post_ra>
// kernel: tpu_custom_call.1
= control target key start
LH: loop header
LB: loop body
LE: loop exit
PB: predicated region body
PF: predicated region fallthrough
CT: control target
= control target key end

     0   :  { %8 = vsyncpa [#allocation4], 0  ;;  %s291_s0 = inlined_call_operand.hbm [shape: f32[2,32], index: 0, kind: input, shape index: {}]   ;;  %s292_s1 = inlined_call_operand.vmem [shape: f32[2,32], index: 1, kind: input, shape index: {}]   ;;  %s293_s2 = inlined_call_operand.hbm [shape: f32[8,512], index: 2, kind: input, shape index: {}]   ;;  %s294_s3 = inlined_call_operand.hbm [shape: f32[1,128], index: 3, kind: output, shape index: {}]  }
   0x1   :  { %9 = vsyncpa [#allocation7], 0 }
   0x2   :  { %10 = vsyncpa [#allocation5], 0  ;;  %s227_s12 = smov [#allocation3]   ;;  %s228_s14 = smov [#allocation6]  }
   0x3   :  { %s17_s13 = sshll.u32 %s227_s12, 4  ;;  %s33_s15 = sshll.u32 %s228_s14, 4  ;;  %s18_s13 = int_to_ptr.vmem [resolvable:$true] %s17_s13  ;;  %s34_s15 = int_to_ptr.vmem [resolvable:$true] %s33_s15 }
   0x4   :  { %s155_s18 = scalar_lea.hbm %s291_s0, 32 }
   0x5   :  { %p156_p0 = scmp.ne.s32.totalorder %s291_s0, %s155_s18  ;;  %p159_p1 = scmp.lt.u32.totalorder %s155_s18, %s291_s0 }
   0x7   :  { %p161_p2 = pnand %p159_p1, %p156_p0 }
   0x9   :  { %164 = shalt.err (!%p161_p2)
}
   0xa   :  { %s165_s23 = scalar_lea.vmem %s18_s13, 32  ;;  %p170_p4 = scmp.lt.s32.totalorder %s18_s13, %s18_s13 }
   0xb   :  { %p166_p3 = scmp.ne.s32.totalorder %s18_s13, %s165_s23  ;;  %p171_p5 = scmp.lt.s32.totalorder %s165_s23, %s165_s23 }
   0xd   :  { %p172_p6 = por %p171_p5, %p170_p4 }
   0xf   :  { %p173_p7 = pnand %p172_p6, %p166_p3 }
  0x11   :  { %176 = shalt.err (!%p173_p7)
}
  0x12   :  { %20 = dma.hbm_to_vmem [thread:$0]  %s291_s0, 32, %s18_s13, [#allocation4]  }
  0x13   :  { %s177_s28 = scalar_lea.hbm %s293_s2, 512 }
  0x14   :  { %p178_p8 = scmp.ne.s32.totalorder %s293_s2, %s177_s28  ;;  %p181_p9 = scmp.lt.u32.totalorder %s177_s28, %s293_s2 }
  0x16   :  { %p183_p10 = pnand %p181_p9, %p178_p8 }
  0x18   :  { %186 = shalt.err (!%p183_p10)
}
  0x19   :  { %s187_s6 = scalar_lea.vmem %s34_s15, 512  ;;  %p192_p12 = scmp.lt.s32.totalorder %s34_s15, %s34_s15 }
  0x1a   :  { %p188_p11 = scmp.ne.s32.totalorder %s34_s15, %s187_s6  ;;  %p193_p13 = scmp.lt.s32.totalorder %s187_s6, %s187_s6 }
  0x1c   :  { %p194_p0 = por %p193_p13, %p192_p12 }
  0x1e   :  { %p195_p1 = pnand %p194_p0, %p188_p11 }
  0x20   :  { %198 = shalt.err (!%p195_p1)
}
  0x21   :  { %36 = dma.hbm_to_vmem [thread:$0]  %s293_s2, 512, %s34_s15, [#allocation7]  }
  0x22   :  { %221 = dma.done.wait [#allocation4], 32  }
  0x23   :  { %222 = vsyncadd [#allocation4], 4294967264 }
  0x24   :  { %223 = dma.done.wait [#allocation7], 512  }
  0x25   :  { %224 = vsyncadd [#allocation7], 4294966784  ;;  %v52_v0 = vld [vmem:[#allocation6] sm:$0xff]  ;;  %v53_v1 = vld [vmem:[#allocation6 + $0x8] sm:$0xff]  ;;  %vm106_vm1 = vcmask 254976   ;;  %v119_v36 = vlaneseq  ;;  %s229_s2 = smov [#allocation8]  }
  0x26   :  { %v54_v2 = vld [vmem:[#allocation6 + $0x10] sm:$0xff]  ;;  %v55_v3 = vld [vmem:[#allocation6 + $0x18] sm:$0xff]  ;;  %v56_v4 = vmul.f32 %v52_v0, %v52_v0  ;;  %v57_v5 = vmul.f32 %v53_v1, %v53_v1  ;;  %s134_s10 = sshll.u32 %s229_s2, 4  ;;  %s135_s10 = int_to_ptr.vmem [resolvable:$true] %s134_s10 }
  0x27   :  { %v58_v6 = vmul.f32 %v54_v2, %v54_v2  ;;  %v95_v7 = vld [vmem:[#allocation3] sm:$0x3]  ;;  %v59_v9 = vmul.f32 %v55_v3, %v55_v3  ;;  %v120_v37 = vand.u32 127, %v119_v36  ;;  %s199_s12 = scalar_lea.vmem %s135_s10, 16  ;;  %s203_s13 = scalar_lea.vmem %s135_s10, 32 }
  0x28   :  { %v96_v8 = vld [vmem:[%s292_s1] sm:$0x3]  ;;  %151 = vlog2.f32 %v95_v7  ;;  %v83_v10 = vadd.f32 %v57_v5, %v56_v4  ;;  %p200_p2 = scmp.ne.s32.totalorder %s135_s10, %s199_s12  ;;  %p204_p3 = scmp.lt.s32.totalorder %s135_s10, %s135_s10 }
  0x29   :  { %vm97_vm0 = vcmp.gt.f32.partialorder %v96_v8, 0.0  ;;  %vm122_vm2 = vcmp.eq.s32.totalorder %v120_v37, 1  ;;  %vm121_vm3 = vcmp.eq.s32.totalorder %v120_v37, 0  ;;  %p205_p4 = scmp.lt.s32.totalorder %s203_s13, %s199_s12 }
  0x2a   :  { %v98_v11 = vsel %vm97_vm0, %v96_v8, 1.0  ;;  %v84_v12 = vadd.f32 %v83_v10, %v58_v6 }
  0x2b   :  { %153 = vlog2.f32 %v98_v11  ;;  %p206_p5 = por %p205_p4, %p204_p3 }
  0x2c   :  { %v85_v13 = vadd.f32 %v84_v12, %v59_v9 }
  0x2d   :  { %p207_p6 = pnand %p206_p5, %p200_p2 }
  0x2e   :  { %86 = vadd.xlane.f32.xlu0 %v85_v13 }
  0x32   :  { %v152_v14 = vpop.eup %151 }
  0x33   :  { %v102_v15 = vmul.f32 0.6931472, %v152_v14 }
  0x35   :  { %v154_v16 = vpop.eup %153 }
  0x36   :  { %v100_v17 = vmul.f32 0.6931472, %v154_v16 }
  0x38   :  { %v103_v18 = vsub.f32 %v100_v17, %v102_v15 }
  0x3a   :  { %v104_v19 = vmul.f32 %v103_v18, %v96_v8 }
  0x3c   :  { %v105_v20 = vsel %vm97_vm0, %v104_v19, 0.0 }
  0x3d   :  { %v107_v21 = vsel %vm106_vm1, %v105_v20, 0.0 }
  0x3e   :  { %108 = vadd.xlane.f32.xlu0 %v107_v21 }
  0xbb   :  { %v87_v22 = vpop.xlane.xlu0 %86 }
  0xbc   :  { %v88_v23 = vrot.slane %v87_v22, 4 }
  0xbe   :  { %v89_v24 = vadd.f32 %v88_v23, %v87_v22 }
  0xc0   :  { %v90_v25 = vrot.slane %v89_v24, 2 }
  0xc2   :  { %v91_v26 = vadd.f32 %v90_v25, %v89_v24 }
  0xc4   :  { %v92_v27 = vrot.slane %v91_v26, 1 }
  0xc6   :  { %v93_v28 = vadd.f32 %v92_v27, %v91_v26 }
  0xc8   :  { %144 = vpush %v93_v28 }
  0xcb   :  { %v109_v29 = vpop.xlane.xlu0 %108 }
  0xcc   :  { %v110_v30 = vrot.slane %v109_v29, 4 }
  0xce   :  { %v111_v31 = vadd.f32 %v110_v30, %v109_v29 }
  0xd0   :  { %v112_v32 = vrot.slane %v111_v31, 2 }
  0xd2   :  { %v113_v33 = vadd.f32 %v112_v32, %v111_v31 }
  0xd4   :  { %v114_v34 = vrot.slane %v113_v33, 1 }
  0xd6   :  { %v115_v35 = vadd.f32 %v114_v34, %v113_v33 }
  0xd8   :  { %146 = vpush %v115_v35 }
  0xf9   :  { %s145_s1 = spop %144 }
  0xfa   :  { %v125_v39 = vstv %s145_s1 }
 0x109   :  { %s147_s11 = spop %146 }
 0x10a   :  { %v123_v38 = vstv %s147_s11 }
 0x10b   :  { %v124_v40 = vsel %vm122_vm2, %v123_v38, 0.0 }
 0x10c   :  { %v126_v41 = vsel %vm121_vm3, %v125_v39, %v124_v40 }
 0x10d   :  { %127 = vst [vmem:[#allocation8] sm:$0x1] %v126_v41 }
 0x10e   :  { %210 = shalt.err (!%p207_p6)
}
 0x10f   :  { %s211_s16 = scalar_lea.hbm %s294_s3, 16 }
 0x110   :  { %p212_p7 = scmp.ne.s32.totalorder %s294_s3, %s211_s16  ;;  %p215_p8 = scmp.lt.u32.totalorder %s211_s16, %s294_s3 }
 0x112   :  { %p217_p9 = pnand %p215_p8, %p212_p7 }
 0x114   :  { %220 = shalt.err (!%p217_p9)
}
 0x115   :  { %137 = dma.vmem_to_hbm [thread:$0]  %s135_s10, 16, %s294_s3, [#allocation5]  }
 0x116   :  { %225 = dma.done.wait [#allocation5], 16  }
 0x117   :  { %226 = vsyncadd [#allocation5], 4294967280 }
 0x118   :  { %141 = vsyncpa [#allocation4], 1 }
 0x119   :  { %142 = vsyncpa [#allocation7], 1 }
 0x11a   :  { %143 = vsyncpa [#allocation5], 1 }

</bundles_post_ra>
